<compile_context>
chip_gen: v7x
topology: tpu7x:2x2x1
jax: 0.10.0
libtpu: 0.0.40
codegen_flags: <defaults>
</compile_context>

<pallas_src>
import math

import jax
import jax.numpy as jnp
from jax import lax
from jax.experimental import pallas as pl
from jax.experimental.pallas import tpu as pltpu

HIDDEN = 128   # fixed by the module definition (nn.Linear(n_pixels, 128))
SUBLANE = 8


def _round_up(x, m):
    return (x + m - 1) // m * m


def _gelu_exact(x):
    # PyTorch nn.GELU() default = exact erf formulation.
    return 0.5 * x * (1.0 + lax.erf(x * (1.0 / jnp.sqrt(2.0).astype(x.dtype))))


def _mlp_kernel(x_ref, pe_ref, w1_ref, w2_ref, b2_ref, o_ref):
    # x_ref : (tm, P)      pe_ref: (tm, 128)   (pe + b1, repeats every T rows)
    # w1_ref: (P, 128)     w2_ref: (128, C)    b2_ref: (1, C)
    # o_ref : (tm, C)
    h = jnp.dot(x_ref[...], w1_ref[...], preferred_element_type=jnp.float32)
    h = _gelu_exact(h + pe_ref[...])
    out = jnp.dot(h.astype(w2_ref.dtype), w2_ref[...],
                  preferred_element_type=jnp.float32)
    o_ref[...] = (out + b2_ref[...]).astype(o_ref.dtype)


def per_patch_mlp(x, w1, b1, pe, w2, b2, *, row_tile=1024, use_bf16=False):
    """x: (B, T, P); w1: (P, 128); b1: (128,); pe: (1, T, 128);
    w2: (128, C); b2: (C,). Returns (B, T, C)."""
    B, T, P = x.shape
    H, C = w2.shape
    assert H == HIDDEN and w1.shape == (P, HIDDEN)

    M = B * T
    pe1 = pe.reshape(T, HIDDEN) + b1            # fold b1 into pe once

    # Row tile tm: multiple of 8 (sublane) and, when cheap, a multiple of T so
    # the pe pattern repeats per tile and can live resident in VMEM.
    L = (SUBLANE * T) // math.gcd(SUBLANE, T)   # lcm(8, T)
    resident_pe = L <= max(row_tile, 4096)      # resident pe tile stays <= ~2 MiB
    if resident_pe:
        if M <= row_tile:
            tm = _round_up(M, L)
        else:
            tm = max(L, (row_tile // L) * L)
        pe_arr = jnp.tile(pe1, (tm // T, 1))                     # (tm, 128)
        pe_spec = pl.BlockSpec((tm, HIDDEN), lambda i: (0, 0))   # resident
    else:
        # Fallback: stream (pe + b1) per flattened row (previous behavior).
        tm = _round_up(M, SUBLANE) if M <= row_tile else row_tile
        pe_arr = jnp.broadcast_to(pe1, (B, T, HIDDEN)).reshape(M, HIDDEN)
        pe_spec = pl.BlockSpec((tm, HIDDEN), lambda i: (i, 0))

    Mp = _round_up(M, tm)
    x_rows = x.reshape(M, P)
    if Mp != M:
        x_rows = jnp.pad(x_rows, ((0, Mp - M), (0, 0)))
        if not resident_pe:
            pe_arr = jnp.pad(pe_arr, ((0, Mp - M), (0, 0)))

    b2r = b2.reshape(1, C)

    if use_bf16:
        # v6e/v7x: bf16 MXU inputs + halved activation/weight DMA bytes.
        # Numerics diverge slightly from the f32 reference -- gate on tolerance.
        x_rows = x_rows.astype(jnp.bfloat16)
        w1 = w1.astype(jnp.bfloat16)
        w2 = w2.astype(jnp.bfloat16)

    grid = (Mp // tm,)

    out = pl.pallas_call(
        _mlp_kernel,
        out_shape=jax.ShapeDtypeStruct((Mp, C), x.dtype),
        grid_spec=pltpu.PrefetchScalarGridSpec(
            num_scalar_prefetch=0,
            grid=grid,
            in_specs=[
                pl.BlockSpec((tm, P), lambda i: (i, 0)),        # x rows (streamed)
                pe_spec,                                        # pe + b1
                pl.BlockSpec((P, HIDDEN), lambda i: (0, 0)),    # W1 (resident)
                pl.BlockSpec((HIDDEN, C), lambda i: (0, 0)),    # W2 (resident)
                pl.BlockSpec((1, C), lambda i: (0, 0)),         # b2 (resident)
            ],
            out_specs=pl.BlockSpec((tm, C), lambda i: (i, 0)),
        ),
        compiler_params=pltpu.CompilerParams(
            dimension_semantics=("parallel",),
        ),
    )(x_rows, pe_arr, w1, w2, b2r)

    if Mp != M:
        out = out[:M]
    return out.reshape(B, T, C)


def init_params(key, n_pixels, n_channel, n_tokens):
    """Deterministic synthetic parameters matching the PyTorch module shapes."""
    k1, k2, k3, k4, k5 = jax.random.split(key, 5)
    # nn.Linear(n_pixels, 128): weight (128, n_pixels) -> stored transposed (n_pixels, 128)
    lim1 = 1.0 / jnp.sqrt(n_pixels)
    w1 = jax.random.uniform(k1, (n_pixels, HIDDEN), jnp.float32, -lim1, lim1)
    b1 = jax.random.uniform(k2, (HIDDEN,), jnp.float32, -lim1, lim1)
    # nn.Linear(128, n_channel): weight (n_channel, 128) -> stored transposed (128, n_channel)
    lim2 = 1.0 / jnp.sqrt(HIDDEN)
    w2 = jax.random.uniform(k3, (HIDDEN, n_channel), jnp.float32, -lim2, lim2)
    b2 = jax.random.uniform(k4, (n_channel,), jnp.float32, -lim2, lim2)
    # pe: (1, n_tokens, 128) ~ N(0,1) * 0.1
    pe = jax.random.normal(k5, (1, n_tokens, HIDDEN), jnp.float32) * 0.1
    return w1, b1, pe, w2, b2


def per_patch_mlp_ref(x, w1, b1, pe, w2, b2):
    h = jnp.einsum("btp,ph->bth", x, w1) + b1 + pe   # pe broadcasts over batch
    h = jax.nn.gelu(h, approximate=False)
    return jnp.einsum("bth,hc->btc", h, w2) + b2


if __name__ == "__main__":
    # Small shapes consistent with the module: batch=2, tokens=8, pixels=16, channels=4.
    B, n_tokens, n_pixels, n_channel = 2, 8, 16, 4

    key = jax.random.PRNGKey(0)
    kx, kp = jax.random.split(key)
    x = jax.random.normal(kx, (B, n_tokens, n_pixels), jnp.float32)
    w1, b1, pe, w2, b2 = init_params(kp, n_pixels, n_channel, n_tokens)

    out = per_patch_mlp(x, w1, b1, pe, w2, b2)
    out = jax.block_until_ready(out)

    ref = per_patch_mlp_ref(x, w1, b1, pe, w2, b2)
    assert out.shape == (B, n_tokens, n_channel)
    assert jnp.allclose(out, ref, atol=1e-5, rtol=1e-5), "mismatch vs reference"

    print("KERNEL_OK")
</pallas_src>

<mosaic_0001>
module attributes {stable_mosaic.version = 11 : i64} {
  func.func @_mlp_kernel(%arg0: i32, %arg1: memref<16x16xf32, #tpu.memory_space<vmem>>, %arg2: memref<16x128xf32, #tpu.memory_space<vmem>>, %arg3: memref<16x128xf32, #tpu.memory_space<vmem>>, %arg4: memref<128x4xf32, #tpu.memory_space<vmem>>, %arg5: memref<1x4xf32, #tpu.memory_space<vmem>>, %arg6: memref<16x4xf32, #tpu.memory_space<vmem>>) attributes {dimension_semantics = [#tpu.dimension_semantics<parallel>], iteration_bounds = array<i64: 1>, scalar_prefetch = 0 : i64, scratch_operands = 0 : i64, tpu.core_type = #tpu.core_type<tc>, window_params = [{transform_indices = @transform_0, window_bounds = array<i64: 16, 16>}, {pipeline_mode = #tpu.pipeline_mode<synchronous>, transform_indices = @transform_1, window_bounds = array<i64: 16, 128>}, {pipeline_mode = #tpu.pipeline_mode<synchronous>, transform_indices = @transform_2, window_bounds = array<i64: 16, 128>}, {pipeline_mode = #tpu.pipeline_mode<synchronous>, transform_indices = @transform_3, window_bounds = array<i64: 128, 4>}, {pipeline_mode = #tpu.pipeline_mode<synchronous>, transform_indices = @transform_4, window_bounds = array<i64: 1, 4>}, {transform_indices = @transform_5, window_bounds = array<i64: 16, 4>}]} {
    %c0 = arith.constant 0 : index
    %c0_0 = arith.constant 0 : index
    %0 = vector.load %arg1[%c0, %c0_0] : memref<16x16xf32, #tpu.memory_space<vmem>>, vector<16x16xf32>
    %c0_1 = arith.constant 0 : index
    %c0_2 = arith.constant 0 : index
    %1 = vector.load %arg3[%c0_1, %c0_2] : memref<16x128xf32, #tpu.memory_space<vmem>>, vector<16x128xf32>
    %cst = arith.constant dense<0.000000e+00> : vector<16x128xf32>
    %2 = tpu.matmul %0, %1, %cst {dimension_numbers = #tpu.dot_dimension_numbers<[1], [0], [0], [1], [0, 0, 1, 1], [], []>} : vector<16x16xf32>, vector<16x128xf32>, vector<16x128xf32> -> vector<16x128xf32>
    %c0_3 = arith.constant 0 : index
    %c0_4 = arith.constant 0 : index
    %3 = vector.load %arg2[%c0_3, %c0_4] : memref<16x128xf32, #tpu.memory_space<vmem>>, vector<16x128xf32>
    %4 = arith.addf %2, %3 : vector<16x128xf32>
    %cst_5 = arith.constant 5.000000e-01 : f32
    %5 = vector.broadcast %cst_5 : f32 to vector<16x128xf32>
    %6 = arith.mulf %5, %4 : vector<16x128xf32>
    %cst_6 = arith.constant 2.000000e+00 : f32
    %7 = math.sqrt %cst_6 : f32
    %cst_7 = arith.constant 1.000000e+00 : f32
    %8 = arith.divf %cst_7, %7 : f32
    %9 = vector.broadcast %8 : f32 to vector<16x128xf32>
    %10 = arith.mulf %4, %9 : vector<16x128xf32>
    %11 = math.erf %10 : vector<16x128xf32>
    %cst_8 = arith.constant 1.000000e+00 : f32
    %12 = vector.broadcast %cst_8 : f32 to vector<16x128xf32>
    %13 = arith.addf %12, %11 : vector<16x128xf32>
    %14 = arith.mulf %6, %13 : vector<16x128xf32>
    %c0_9 = arith.constant 0 : index
    %c0_10 = arith.constant 0 : index
    %15 = vector.load %arg4[%c0_9, %c0_10] : memref<128x4xf32, #tpu.memory_space<vmem>>, vector<128x4xf32>
    %cst_11 = arith.constant dense<0.000000e+00> : vector<16x4xf32>
    %16 = tpu.matmul %14, %15, %cst_11 {dimension_numbers = #tpu.dot_dimension_numbers<[1], [0], [0], [1], [0, 0, 1, 1], [], []>} : vector<16x128xf32>, vector<128x4xf32>, vector<16x4xf32> -> vector<16x4xf32>
    %c0_12 = arith.constant 0 : index
    %c0_13 = arith.constant 0 : index
    %17 = vector.load %arg5[%c0_12, %c0_13] : memref<1x4xf32, #tpu.memory_space<vmem>>, vector<1x4xf32>
    %18 = vector.broadcast %17 : vector<1x4xf32> to vector<16x4xf32>
    %19 = arith.addf %16, %18 : vector<16x4xf32>
    %c0_14 = arith.constant 0 : index
    %c0_15 = arith.constant 0 : index
    %20 = vector.load %arg6[%c0_14, %c0_15] : memref<16x4xf32, #tpu.memory_space<vmem>>, vector<16x4xf32>
    tpu.vector_store %arg6[%c0_14, %c0_15], %19 {strides = array<i32>} : memref<16x4xf32, #tpu.memory_space<vmem>>, vector<16x4xf32>,
    return
  }
  func.func @transform_0(%arg0: i32) -> (i32, i32) {
    %c0_i32 = arith.constant 0 : i32
    %c0_i32_0 = arith.constant 0 : i32
    return %arg0, %c0_i32 : i32, i32
  }
  func.func @transform_1(%arg0: i32) -> (i32, i32) {
    %c0_i32 = arith.constant 0 : i32
    %c0_i32_0 = arith.constant 0 : i32
    %c0_i32_1 = arith.constant 0 : i32
    return %c0_i32, %c0_i32_0 : i32, i32
  }
  func.func @transform_2(%arg0: i32) -> (i32, i32) {
    %c0_i32 = arith.constant 0 : i32
    %c0_i32_0 = arith.constant 0 : i32
    %c0_i32_1 = arith.constant 0 : i32
    return %c0_i32, %c0_i32_0 : i32, i32
  }
  func.func @transform_3(%arg0: i32) -> (i32, i32) {
    %c0_i32 = arith.constant 0 : i32
    %c0_i32_0 = arith.constant 0 : i32
    %c0_i32_1 = arith.constant 0 : i32
    return %c0_i32, %c0_i32_0 : i32, i32
  }
  func.func @transform_4(%arg0: i32) -> (i32, i32) {
    %c0_i32 = arith.constant 0 : i32
    %c0_i32_0 = arith.constant 0 : i32
    %c0_i32_1 = arith.constant 0 : i32
    return %c0_i32, %c0_i32_0 : i32, i32
  }
  func.func @transform_5(%arg0: i32) -> (i32, i32) {
    %c0_i32 = arith.constant 0 : i32
    %c0_i32_0 = arith.constant 0 : i32
    return %arg0, %c0_i32 : i32, i32
  }
}

</mosaic_0001>

<bundles_post_ra>
// kernel: tpu_custom_call.1
= control target key start
LH: loop header
LB: loop body
LE: loop exit
PB: predicated region body
PF: predicated region fallthrough
CT: control target
= control target key end

     0   :  { %vm26_vm0 = vcmask 130048   ;;  %vm216_vm1 = vcmask 31744   ;;  %s437_s2 = inlined_call_operand.vmem [shape: f32[16,128], index: 2, kind: input, shape index: {}]   ;;  %s438_s0 = inlined_call_operand.vmem [shape: f32[16,16], index: 0, kind: input, shape index: {}]   ;;  %s439_s3 = inlined_call_operand.vmem [shape: f32[128,4], index: 3, kind: input, shape index: {}]   ;;  %s440_s1 = inlined_call_operand.vmem [shape: f32[16,128], index: 1, kind: input, shape index: {}]   ;;  %s441_s4 = inlined_call_operand.vmem [shape: f32[1,4], index: 4, kind: input, shape index: {}]   ;;  %s442_s5 = inlined_call_operand.vmem [shape: f32[16,4], index: 5, kind: output, shape index: {}]  }
   0x1   :  { %v22_v0 = vld [vmem:[%s437_s2] sm:$0xff]  ;;  %v23_v1 = vld [vmem:[%s437_s2 + $0x8] sm:$0xff]  ;;  %v120_v7 = vld [vmem:[%s439_s3 + $0x10] sm:$0xff] }
   0x2   :  { %v20_v2 = vld [vmem:[%s438_s0] sm:$0xff]  ;;  %v290_v3 = vpack.c.bf16 %v23_v1, %v22_v0  ;;  %v119_v5 = vld [vmem:[%s439_s3 + $0x8] sm:$0xff]  ;;  %v121_v8 = vld [vmem:[%s439_s3 + $0x18] sm:$0xff] }
   0x3   :  { %252 = vmatprep.mubr.msk.f32.mxu0 %vm26_vm0, %v20_v2  ;;  %v118_v4 = vld [vmem:[%s439_s3] sm:$0xff]  ;;  %v298_v9 = vpack.c.bf16 %v121_v8, %v120_v7  ;;  %v123_v11 = vld [vmem:[%s439_s3 + $0x28] sm:$0xff]  ;;  %v124_v14 = vld [vmem:[%s439_s3 + $0x30] sm:$0xff] }
   0x4   :  { %v294_v6 = vpack.c.bf16 %v119_v5, %v118_v4  ;;  %291 = vmatprep.subr.bf16.mxu0 %v290_v3  ;;  %v122_v10 = vld [vmem:[%s439_s3 + $0x20] sm:$0xff]  ;;  %v21_v12 = vld [vmem:[%s438_s0 + $0x8] sm:$0xff]  ;;  %v125_v15 = vld [vmem:[%s439_s3 + $0x38] sm:$0xff] }
   0x5   :  { %293 = vmatpush3.bf16.msra.mxu0 %v290_v3  ;;  %v302_v13 = vpack.c.bf16 %v123_v11, %v122_v10  ;;  %v306_v16 = vpack.c.bf16 %v125_v15, %v124_v14  ;;  %v126_v17 = vld [vmem:[%s439_s3 + $0x40] sm:$0xff]  ;;  %v127_v18 = vld [vmem:[%s439_s3 + $0x48] sm:$0xff]  ;;  %v128_v20 = vld [vmem:[%s439_s3 + $0x50] sm:$0xff] }
   0x6   :  { %295 = vmatprep.subr.bf16.mxu1 %v294_v6  ;;  %v310_v19 = vpack.c.bf16 %v127_v18, %v126_v17  ;;  %v129_v21 = vld [vmem:[%s439_s3 + $0x58] sm:$0xff]  ;;  %v130_v23 = vld [vmem:[%s439_s3 + $0x60] sm:$0xff]  ;;  %v131_v24 = vld [vmem:[%s439_s3 + $0x68] sm:$0xff] }
   0x7   :  { %297 = vmatpush3.bf16.msra.mxu1 %v294_v6  ;;  %v314_v22 = vpack.c.bf16 %v129_v21, %v128_v20  ;;  %v318_v25 = vpack.c.bf16 %v131_v24, %v130_v23  ;;  %v132_v26 = vld [vmem:[%s439_s3 + $0x70] sm:$0xff]  ;;  %v133_v27 = vld [vmem:[%s439_s3 + $0x78] sm:$0xff]  ;;  %v25_v29 = vld [vmem:[%s440_s1 + $0x8] sm:$0xff] }
   0x8   :  { %299 = vmatprep.subr.bf16.mxu1 %v298_v9  ;;  %253 = vmatmul.mubr.msk.f32.vlgmr.msra.gmra.mrb[0].mxu0 %vm26_vm0, %v21_v12  ;;  %v322_v28 = vpack.c.bf16 %v133_v27, %v132_v26  ;;  %v24_v30 = vld [vmem:[%s440_s1] sm:$0xff] }
   0x9   :  { %v225_v45 = vld [vmem:[%s441_s4] ss:$0 sm:$0xff] }
   0xb   :  { %301 = vmatpush3.bf16.msra.mxu1 %v298_v9 }
   0xc   :  { %303 = vmatprep.subr.bf16.mxu1 %v302_v13 }
   0xf   :  { %305 = vmatpush3.bf16.msra.mxu1 %v302_v13 }
  0x10   :  { %307 = vmatprep.subr.bf16.mxu1 %v306_v16 }
  0x13   :  { %309 = vmatpush3.bf16.msra.mxu1 %v306_v16 }
  0x14   :  { %311 = vmatprep.subr.bf16.mxu1 %v310_v19 }
  0x17   :  { %313 = vmatpush3.bf16.msra.mxu1 %v310_v19 }
  0x18   :  { %315 = vmatprep.subr.bf16.mxu1 %v314_v22 }
  0x1b   :  { %317 = vmatpush3.bf16.msra.mxu1 %v314_v22 }
  0x1c   :  { %319 = vmatprep.subr.bf16.mxu1 %v318_v25 }
  0x1f   :  { %321 = vmatpush3.bf16.msra.mxu1 %v318_v25 }
  0x20   :  { %323 = vmatprep.subr.bf16.mxu1 %v322_v28 }
  0x23   :  { %325 = vmatpush3.bf16.msra.mxu1 %v322_v28 }
  0xdb   :  { %v254_v31 = vpop.f32.mrb[0].mxu0 }
  0xdc   :  { %v105_v32 = vadd.f32 %v254_v31, %v25_v29  ;;  %v99_v33 = vpop.f32.mrb[1].mxu0 }
  0xdd   :  { %v100_v34 = vadd.f32 %v99_v33, %v24_v30 }
  0xde   :  { %v111_v35 = vmul.f32 0.70710677, %v105_v32  ;;  %v109_v42 = vmul.f32 0.5, %v105_v32 }
  0xdf   :  { %v110_v36 = vmul.f32 0.70710677, %v100_v34  ;;  %v108_v40 = vmul.f32 0.5, %v100_v34 }
  0xe0   :  { %326 = verf.f32 %v111_v35 }
  0xe1   :  { %328 = verf.f32 %v110_v36 }
  0xea   :  { %v327_v37 = vpop.eup %326 }
  0xeb   :  { %v329_v38 = vpop.eup %328  ;;  %v115_v39 = vadd.f32 1.0, %v327_v37 }
  0xec   :  { %v114_v41 = vadd.f32 1.0, %v329_v38 }
  0xed   :  { %v117_v44 = vmul.f32 %v115_v39, %v109_v42 }
  0xee   :  { %v116_v43 = vmul.f32 %v114_v41, %v108_v40 }
  0xf0   :  { %287 = vmatprep.mubr.f32.mxu1 %v116_v43 }
  0xf1   :  { %288 = vmatmul.mubr.f32.vlgmr.msra.gmra.mrb[0].mxu1 %v117_v44 }
 0x1c4   :  { %v289_v46 = vpop.f32.mrb[0].mxu1 }
 0x1c5   :  { %v213_v47 = vadd.f32 %v289_v46, %v225_v45  ;;  %v207_v48 = vpop.f32.mrb[1].mxu1 }
 0x1c6   :  { %v208_v49 = vadd.f32 %v225_v45, %v207_v48 }
 0x1c7   :  { %218 = vst.msk [vmem:[%s442_s5 + $0x8] sm:$0xff] %vm216_vm1, %v213_v47 }
 0x1c8   :  { %217 = vst.msk [vmem:[%s442_s5] sm:$0xff] %vm216_vm1, %v208_v49 }

</bundles_post_ra>
